<compile_context>
chip_gen: v5e
topology: v5e:2x2
jax: 0.10.0
libtpu: 0.0.40
codegen_flags: <defaults>
</compile_context>

<pallas_src>
import math
from functools import partial

import jax
import jax.numpy as jnp
from jax.experimental import pallas as pl
from jax.experimental.pallas import tpu as pltpu

# ----------------------- small synthetic config -----------------------------
VOCAB_SIZE = 100
EMB_DIM = 16                 # config.embedding_size (conv width = 2 * EMB_DIM)
SEQ_LEN = 8                  # config.sequence_length
FILTER_COUNT = 8             # config.filter_count
KERNEL_SIZES = (2, 3, 4)     # config.kernel_size
NUM_CLASS = 4                # config.labels
BATCH = 2

FEAT_DIM = 2 * EMB_DIM                        # conv input width D = 32
K_MAX = max(KERNEL_SIZES)                     # 4
T_MAX = SEQ_LEN - min(KERNEL_SIZES) + 1       # 7 (longest conv output length)
T_PAD = ((T_MAX + 7) // 8) * 8                # 8 (sublane-aligned time)
KD = K_MAX * FEAT_DIM                         # 128 (fused contraction dim)
FC_IN = len(KERNEL_SIZES) * FILTER_COUNT      # 24
N_PAD = 128                                   # lane-dense packed conv channels
NEG = -1e30                                   # additive mask for invalid t


# ------------------------------ Pallas kernel -------------------------------
def _textcnn_kernel(Bt, slab_ref, wp_ref, bp_ref, mask_ref, fcw_ref, fcb_ref,
                    out_ref):
    """Fused conv (all taps, all kernel sizes) + masked max-pool + fc.

      slab_ref : (Bt*T_PAD, KD)     bf16  im2col activations
      wp_ref   : (KD, N_PAD)        bf16  packed conv weights (zero-padded)
      bp_ref   : (1, N_PAD)         f32   packed conv bias
      mask_ref : (Bt*T_PAD, N_PAD)  f32   0 where t valid for that column, NEG else
      fcw_ref  : (N_PAD, C)         bf16  packed fc weight (zero rows >= FC_IN)
      fcb_ref  : (1, C)             f32   fc bias
      out_ref  : (Bt, C)            f32   logits
    """
    # One K=128 matmul replaces the 9 tiny per-tap matmuls.
    conv = jnp.dot(slab_ref[...], wp_ref[...],
                   preferred_element_type=jnp.float32)           # (Bt*T_PAD, N_PAD)
    conv = conv + mask_ref[...]                                  # kill invalid t
    # Aligned reshape (16,128)->(Bt,8,128); max over the sublane/time axis.
    pooled = jnp.max(conv.reshape(Bt, T_PAD, N_PAD), axis=1)     # (Bt, N_PAD)
    pooled = pooled + bp_ref[...]                                # bias hoisted past max
    logits = jnp.dot(pooled.astype(jnp.bfloat16), fcw_ref[...],
                     preferred_element_type=jnp.float32) + fcb_ref[...]
    out_ref[...] = logits.astype(out_ref.dtype)


# --------------------------- parameter packing -------------------------------
def pack_params(params):
    """Pack conv / fc weights into the fused layouts consumed by the kernel."""
    wp = jnp.zeros((KD, N_PAD), jnp.float32)
    bp = jnp.zeros((1, N_PAD), jnp.float32)
    for idx, k in enumerate(KERNEL_SIZES):
        w = params[f"conv_w_{k}"].reshape(k * FEAT_DIM, FILTER_COUNT)
        c0, c1 = idx * FILTER_COUNT, (idx + 1) * FILTER_COUNT
        wp = wp.at[:k * FEAT_DIM, c0:c1].set(w)
        bp = bp.at[:, c0:c1].set(params[f"conv_b_{k}"])
    fcw = jnp.zeros((N_PAD, NUM_CLASS), jnp.float32)
    fcw = fcw.at[:FC_IN, :].set(params["fc_w"])
    return {
        "embedding": params["embedding"],
        "conv_w_packed": wp.astype(jnp.bfloat16),
        "conv_b_packed": bp,
        "fc_w_packed": fcw.astype(jnp.bfloat16),
        "fc_b": params["fc_b"],
    }


def _build_time_mask(Bt):
    """(Bt*T_PAD, N_PAD) additive mask: 0 for valid time steps, NEG otherwise."""
    t_valid = []
    for k in KERNEL_SIZES:
        t_valid += [SEQ_LEN - k + 1] * FILTER_COUNT
    t_valid += [T_MAX] * (N_PAD - FC_IN)            # padded cols stay finite (-> 0)
    t_valid = jnp.asarray(t_valid, jnp.int32)[None, :]           # (1, N_PAD)
    t_idx = jnp.arange(T_PAD, dtype=jnp.int32)[:, None]          # (T_PAD, 1)
    mask = jnp.where(t_idx < t_valid, 0.0, NEG).astype(jnp.float32)
    return jnp.tile(mask, (Bt, 1))


# ------------------------------- forward ------------------------------------
def morpheme_textcnn_forward(input_ids, words, attention_mask, packed):
    """`words` / `attention_mask` are unused, as in the reference forward.
    Embedding lookup (a gather) and the one-time im2col unfold stay in XLA;
    the fused conv / pool / fc hot path runs inside the Pallas kernel."""
    del words, attention_mask
    B, L = input_ids.shape[0], input_ids.shape[1]

    # Embedding + morpheme-pair concat: (B, L, 2) -> (B, L, 2, E) -> (B, L, 2E)
    x = jnp.take(packed["embedding"], input_ids, axis=0).reshape(B, L, FEAT_DIM)
    # emb_dropout / conv_dropout: identity in eval mode.
    # TODO(synk): training-mode dropout (stochastic masking) not implemented.

    # im2col slab, built once, lane/sublane aligned: (B*T_PAD, K_MAX*FEAT_DIM).
    pad_len = T_PAD + K_MAX - 1 - L
    x_pad = jnp.pad(x, ((0, 0), (0, pad_len), (0, 0)))
    slab = jnp.concatenate([x_pad[:, i:i + T_PAD, :] for i in range(K_MAX)],
                           axis=-1)                               # (B, T_PAD, KD)
    slab = slab.reshape(B * T_PAD, KD).astype(jnp.bfloat16)

    # Batch tile: whole batch while small; 8-aligned tiles once B scales up.
    Bt = 8 if (B > 8 and B % 8 == 0) else B
    grid = (pl.cdiv(B, Bt),)
    mask = _build_time_mask(Bt)

    out = pl.pallas_call(
        partial(_textcnn_kernel, Bt),
        out_shape=jax.ShapeDtypeStruct((B, NUM_CLASS), jnp.float32),
        grid=grid,
        in_specs=[
            pl.BlockSpec((Bt * T_PAD, KD), lambda i: (i, 0)),     # slab (per tile)
            pl.BlockSpec((KD, N_PAD), lambda i: (0, 0)),          # packed conv W
            pl.BlockSpec((1, N_PAD), lambda i: (0, 0)),           # packed conv b
            pl.BlockSpec((Bt * T_PAD, N_PAD), lambda i: (0, 0)),  # time mask
            pl.BlockSpec((N_PAD, NUM_CLASS), lambda i: (0, 0)),   # packed fc W
            pl.BlockSpec((1, NUM_CLASS), lambda i: (0, 0)),       # fc b
        ],
        out_specs=pl.BlockSpec((Bt, NUM_CLASS), lambda i: (i, 0)),
        compiler_params=pltpu.CompilerParams(
            dimension_semantics=("parallel",)),
    )(slab, packed["conv_w_packed"], packed["conv_b_packed"], mask,
      packed["fc_w_packed"], packed["fc_b"])
    return out


# --------------------------- deterministic params ---------------------------
def init_params(key):
    keys = jax.random.split(key, 3 + 2 * len(KERNEL_SIZES))
    params = {}
    params["embedding"] = jax.random.normal(
        keys[0], (VOCAB_SIZE, EMB_DIM), jnp.float32)
    for i, k in enumerate(KERNEL_SIZES):
        fan_in = 1 * k * FEAT_DIM
        bound = 1.0 / math.sqrt(fan_in)
        # stored pre-transposed: PyTorch (F, 1, k, 2E) -> (k, 2E, F)
        params[f"conv_w_{k}"] = jax.random.uniform(
            keys[1 + 2 * i], (k, FEAT_DIM, FILTER_COUNT),
            jnp.float32, -bound, bound)
        params[f"conv_b_{k}"] = jax.random.uniform(
            keys[2 + 2 * i], (1, FILTER_COUNT), jnp.float32, -bound, bound)
    bound = 1.0 / math.sqrt(FC_IN)
    # stored pre-transposed: PyTorch (C, FC_IN) -> (FC_IN, C)
    params["fc_w"] = jax.random.uniform(
        keys[-2], (FC_IN, NUM_CLASS), jnp.float32, -bound, bound)
    params["fc_b"] = jax.random.uniform(
        keys[-1], (1, NUM_CLASS), jnp.float32, -bound, bound)
    return params


if __name__ == "__main__":
    root = jax.random.PRNGKey(0)
    k_param, k_ids = jax.random.split(root)
    params = init_params(k_param)
    packed = pack_params(params)

    # input_: (B, L, 2) token ids (word id + morpheme id per position)
    input_ids = jax.random.randint(k_ids, (BATCH, SEQ_LEN, 2), 0, VOCAB_SIZE,
                                   dtype=jnp.int32)
    words = jnp.zeros((BATCH, SEQ_LEN), jnp.int32)          # unused by forward
    attention_mask = jnp.ones((BATCH, SEQ_LEN), jnp.int32)  # unused by forward

    fwd = jax.jit(morpheme_textcnn_forward)
    logits = fwd(input_ids, words, attention_mask, packed)
    jax.block_until_ready(logits)
    assert logits.shape == (BATCH, NUM_CLASS)
    assert bool(jnp.all(jnp.isfinite(logits)))
    print("KERNEL_OK")
</pallas_src>

<mosaic_0001>
module attributes {stable_mosaic.version = 11 : i64} {
  func.func @_textcnn_kernel(%arg0: i32, %arg1: memref<16x128xbf16, #tpu.memory_space<vmem>>, %arg2: memref<128x128xbf16, #tpu.memory_space<vmem>>, %arg3: memref<1x128xf32, #tpu.memory_space<vmem>>, %arg4: memref<16x128xf32, #tpu.memory_space<vmem>>, %arg5: memref<128x4xbf16, #tpu.memory_space<vmem>>, %arg6: memref<1x4xf32, #tpu.memory_space<vmem>>, %arg7: memref<2x4xf32, #tpu.memory_space<vmem>>) attributes {dimension_semantics = [#tpu.dimension_semantics<parallel>], iteration_bounds = array<i64: 1>, scalar_prefetch = 0 : i64, scratch_operands = 0 : i64, tpu.core_type = #tpu.core_type<tc>, window_params = [{transform_indices = @transform_0, window_bounds = array<i64: 16, 128>}, {pipeline_mode = #tpu.pipeline_mode<synchronous>, transform_indices = @transform_1, window_bounds = array<i64: 128, 128>}, {pipeline_mode = #tpu.pipeline_mode<synchronous>, transform_indices = @transform_2, window_bounds = array<i64: 1, 128>}, {pipeline_mode = #tpu.pipeline_mode<synchronous>, transform_indices = @transform_3, window_bounds = array<i64: 16, 128>}, {pipeline_mode = #tpu.pipeline_mode<synchronous>, transform_indices = @transform_4, window_bounds = array<i64: 128, 4>}, {pipeline_mode = #tpu.pipeline_mode<synchronous>, transform_indices = @transform_5, window_bounds = array<i64: 1, 4>}, {transform_indices = @transform_6, window_bounds = array<i64: 2, 4>}]} {
    %c0 = arith.constant 0 : index
    %c0_0 = arith.constant 0 : index
    %0 = vector.load %arg1[%c0, %c0_0] : memref<16x128xbf16, #tpu.memory_space<vmem>>, vector<16x128xbf16>
    %c0_1 = arith.constant 0 : index
    %c0_2 = arith.constant 0 : index
    %1 = vector.load %arg2[%c0_1, %c0_2] : memref<128x128xbf16, #tpu.memory_space<vmem>>, vector<128x128xbf16>
    %cst = arith.constant dense<0.000000e+00> : vector<16x128xf32>
    %2 = tpu.matmul %0, %1, %cst {dimension_numbers = #tpu.dot_dimension_numbers<[1], [0], [0], [1], [0, 0, 1, 1], [], []>} : vector<16x128xbf16>, vector<128x128xbf16>, vector<16x128xf32> -> vector<16x128xf32>
    %c0_3 = arith.constant 0 : index
    %c0_4 = arith.constant 0 : index
    %3 = vector.load %arg4[%c0_3, %c0_4] : memref<16x128xf32, #tpu.memory_space<vmem>>, vector<16x128xf32>
    %4 = arith.addf %2, %3 : vector<16x128xf32>
    %5 = vector.shape_cast %4 : vector<16x128xf32> to vector<2x8x128xf32>
    %cst_5 = arith.constant dense<0xFF800000> : vector<2x128xf32>
    %6 = vector.multi_reduction <maximumf>, %5, %cst_5 [1] : vector<2x8x128xf32> to vector<2x128xf32>
    %c0_6 = arith.constant 0 : index
    %c0_7 = arith.constant 0 : index
    %7 = vector.load %arg3[%c0_6, %c0_7] : memref<1x128xf32, #tpu.memory_space<vmem>>, vector<1x128xf32>
    %8 = vector.broadcast %7 : vector<1x128xf32> to vector<2x128xf32>
    %9 = arith.addf %6, %8 : vector<2x128xf32>
    %10 = arith.truncf %9 : vector<2x128xf32> to vector<2x128xbf16>
    %c0_8 = arith.constant 0 : index
    %c0_9 = arith.constant 0 : index
    %11 = vector.load %arg5[%c0_8, %c0_9] : memref<128x4xbf16, #tpu.memory_space<vmem>>, vector<128x4xbf16>
    %cst_10 = arith.constant dense<0.000000e+00> : vector<2x4xf32>
    %12 = tpu.matmul %10, %11, %cst_10 {dimension_numbers = #tpu.dot_dimension_numbers<[1], [0], [0], [1], [0, 0, 1, 1], [], []>} : vector<2x128xbf16>, vector<128x4xbf16>, vector<2x4xf32> -> vector<2x4xf32>
    %c0_11 = arith.constant 0 : index
    %c0_12 = arith.constant 0 : index
    %13 = vector.load %arg6[%c0_11, %c0_12] : memref<1x4xf32, #tpu.memory_space<vmem>>, vector<1x4xf32>
    %14 = vector.broadcast %13 : vector<1x4xf32> to vector<2x4xf32>
    %15 = arith.addf %12, %14 : vector<2x4xf32>
    %c0_13 = arith.constant 0 : index
    %c0_14 = arith.constant 0 : index
    %16 = vector.load %arg7[%c0_13, %c0_14] : memref<2x4xf32, #tpu.memory_space<vmem>>, vector<2x4xf32>
    tpu.vector_store %arg7[%c0_13, %c0_14], %15 {strides = array<i32>} : memref<2x4xf32, #tpu.memory_space<vmem>>, vector<2x4xf32>,
    return
  }
  func.func @transform_0(%arg0: i32) -> (i32, i32) {
    %c0_i32 = arith.constant 0 : i32
    %c0_i32_0 = arith.constant 0 : i32
    return %arg0, %c0_i32 : i32, i32
  }
  func.func @transform_1(%arg0: i32) -> (i32, i32) {
    %c0_i32 = arith.constant 0 : i32
    %c0_i32_0 = arith.constant 0 : i32
    %c0_i32_1 = arith.constant 0 : i32
    return %c0_i32, %c0_i32_0 : i32, i32
  }
  func.func @transform_2(%arg0: i32) -> (i32, i32) {
    %c0_i32 = arith.constant 0 : i32
    %c0_i32_0 = arith.constant 0 : i32
    %c0_i32_1 = arith.constant 0 : i32
    return %c0_i32, %c0_i32_0 : i32, i32
  }
  func.func @transform_3(%arg0: i32) -> (i32, i32) {
    %c0_i32 = arith.constant 0 : i32
    %c0_i32_0 = arith.constant 0 : i32
    %c0_i32_1 = arith.constant 0 : i32
    return %c0_i32, %c0_i32_0 : i32, i32
  }
  func.func @transform_4(%arg0: i32) -> (i32, i32) {
    %c0_i32 = arith.constant 0 : i32
    %c0_i32_0 = arith.constant 0 : i32
    %c0_i32_1 = arith.constant 0 : i32
    return %c0_i32, %c0_i32_0 : i32, i32
  }
  func.func @transform_5(%arg0: i32) -> (i32, i32) {
    %c0_i32 = arith.constant 0 : i32
    %c0_i32_0 = arith.constant 0 : i32
    %c0_i32_1 = arith.constant 0 : i32
    return %c0_i32, %c0_i32_0 : i32, i32
  }
  func.func @transform_6(%arg0: i32) -> (i32, i32) {
    %c0_i32 = arith.constant 0 : i32
    %c0_i32_0 = arith.constant 0 : i32
    return %arg0, %c0_i32 : i32, i32
  }
}

</mosaic_0001>

<bundles_post_ra>
// kernel: morpheme_textcnn_forward.1
= control target key start
LH: loop header
LB: loop body
LE: loop exit
PB: predicated region body
PF: predicated region fallthrough
CT: control target
= control target key end

     0   :  { %s456_s0 = inlined_call_operand.vmem [shape: bf16[16,128], index: 0, kind: input, shape index: {}]   ;;  %s457_s1 = inlined_call_operand.vmem [shape: bf16[128,128], index: 1, kind: input, shape index: {}]   ;;  %s458_s2 = inlined_call_operand.vmem [shape: f32[1,128], index: 2, kind: input, shape index: {}]   ;;  %s459_s3 = inlined_call_operand.vmem [shape: f32[16,128], index: 3, kind: input, shape index: {}]   ;;  %s460_s4 = inlined_call_operand.vmem [shape: bf16[128,4], index: 4, kind: input, shape index: {}]   ;;  %s461_s5 = inlined_call_operand.vmem [shape: f32[1,4], index: 5, kind: input, shape index: {}]   ;;  %s462_s6 = inlined_call_operand.hbm [shape: f32[2,4], index: 6, kind: output, shape index: {}]  }
   0x1   :  { %v316_v0 = vld [vmem:[%s457_s1 + $0x38] sm:$0xff]  ;;  %v315_v1 = vld [vmem:[%s457_s1 + $0x30] sm:$0xff] }
   0x2   :  { %98 = vmatpush.bf16.msra.mxu0 %v316_v0 }
   0x3   :  { %11 = vsyncpa [#allocation3], 0  ;;  %v314_v2 = vld [vmem:[%s457_s1 + $0x28] sm:$0xff]  ;;  %v313_v3 = vld [vmem:[%s457_s1 + $0x20] sm:$0xff]  ;;  %vm157_vm0 = vcmask 1041409   ;;  %s354_s11 = smov [#allocation2]  }
   0x4   :  { %v312_v4 = vld [vmem:[%s457_s1 + $0x18] sm:$0xff]  ;;  %v311_v5 = vld [vmem:[%s457_s1 + $0x10] sm:$0xff]  ;;  %v310_v6 = vld [vmem:[%s457_s1 + $0x8] sm:$0xff]  ;;  %s229_s12 = sshll.u32 %s354_s11, 4  ;;  %s231_s14 = sshll.u32 %s462_s6, 4  ;;  %vm222_vm1 = vcmask 25600   ;;  %s230_s12 = int_to_ptr.vmem [resolvable:$true] %s229_s12  ;;  %s232_s14 = int_to_ptr.hbm [resolvable:$true] %s231_s14 }
   0x5   :  { %v309_v7 = vld [vmem:[%s457_s1] sm:$0xff]  ;;  %v324_v9 = vld [vmem:[%s460_s4 + $0x38] sm:$0xff]  ;;  %v323_v10 = vld [vmem:[%s460_s4 + $0x30] sm:$0xff] }
   0x6   :  { %99 = vmatpush.bf16.msra.mxu0 %v315_v1  ;;  %v308_v8 = vld [vmem:[%s456_s0] sm:$0xff]  ;;  %209 = vmatpush.bf16.msra.mxu1 %v324_v9  ;;  %v322_v11 = vld [vmem:[%s460_s4 + $0x28] sm:$0xff]  ;;  %v320_v13 = vld [vmem:[%s460_s4 + $0x18] sm:$0xff] }
   0x7   :  { %v321_v12 = vld [vmem:[%s460_s4 + $0x20] sm:$0xff]  ;;  %v319_v14 = vld [vmem:[%s460_s4 + $0x10] sm:$0xff]  ;;  %v318_v15 = vld [vmem:[%s460_s4 + $0x8] sm:$0xff] }
   0x8   :  { %v317_v16 = vld [vmem:[%s460_s4] sm:$0xff]  ;;  %v43_v22 = vld [vmem:[%s459_s3 + $0x8] sm:$0xff] }
   0x9   :  { %v42_v17 = vld [vmem:[%s459_s3] sm:$0xff] }
   0xa   :  { %100 = vmatpush.bf16.msra.mxu0 %v314_v2  ;;  %210 = vmatpush.bf16.msra.mxu1 %v323_v10  ;;  %v326_v33 = vld [vmem:[%s458_s2] ss:$0 sm:$0xff] }
   0xb   :  { %v327_v45 = vld [vmem:[%s461_s5] ss:$0 sm:$0xff] }
   0xe   :  { %101 = vmatpush.bf16.msra.mxu0 %v313_v3  ;;  %211 = vmatpush.bf16.msra.mxu1 %v322_v11 }
  0x12   :  { %102 = vmatpush.bf16.msra.mxu0 %v312_v4  ;;  %212 = vmatpush.bf16.msra.mxu1 %v321_v12 }
  0x16   :  { %103 = vmatpush.bf16.msra.mxu0 %v311_v5  ;;  %213 = vmatpush.bf16.msra.mxu1 %v320_v13 }
  0x1a   :  { %104 = vmatpush.bf16.msra.mxu0 %v310_v6  ;;  %214 = vmatpush.bf16.msra.mxu1 %v319_v14 }
  0x1e   :  { %105 = vmatpush.bf16.msra.mxu0 %v309_v7  ;;  %215 = vmatpush.bf16.msra.mxu1 %v318_v15 }
  0x21   :  { %106 = vmatmul.bf16.vlgmr.msra.gmra.mxu0 %v308_v8 }
  0x22   :  { %216 = vmatpush.bf16.msra.mxu1 %v317_v16 }
  0x9e   :  { %v107_v18 = vpop.f32.mrf.mxu0 }
  0x9f   :  { %v108_v19 = vadd.f32 %v107_v18, %v42_v17 }
  0xa1   :  { %v112_v20 = vrot.slane %v108_v19, 4 }
  0xa3   :  { %v113_v21 = vmax.f32 %v108_v19, %v112_v20 }
  0xa5   :  { %v114_v23 = vrot.slane %v113_v21, 2 }
  0xa6   :  { %v109_v24 = vpop.f32.mrf.mxu0 }
  0xa7   :  { %v115_v25 = vmax.f32 %v113_v21, %v114_v23  ;;  %v110_v26 = vadd.f32 %v109_v24, %v43_v22 }
  0xa9   :  { %v118_v27 = vrot.slane %v110_v26, 4  ;;  %v116_v28 = vrot.slane %v115_v25, 1 }
  0xab   :  { %v119_v29 = vmax.f32 %v110_v26, %v118_v27  ;;  %v117_v31 = vmax.f32 %v115_v25, %v116_v28 }
  0xad   :  { %v120_v30 = vrot.slane %v119_v29, 2  ;;  %v128_v36 = vadd.f32 %v326_v33, %v117_v31 }
  0xaf   :  { %v121_v32 = vmax.f32 %v119_v29, %v120_v30  ;;  %v130_v38 = vpack.c.bf16 %v128_v36, %v128_v36 }
  0xb1   :  { %v122_v34 = vrot.slane %v121_v32, 1  ;;  %v154_v41 = vunpack.c.l.b16 %v130_v38 }
  0xb3   :  { %v123_v35 = vmax.f32 %v121_v32, %v122_v34 }
  0xb5   :  { %v129_v37 = vadd.f32 %v326_v33, %v123_v35 }
  0xb7   :  { %v131_v39 = vpack.c.bf16 %v129_v37, %v129_v37 }
  0xb9   :  { %v155_v40 = vunpack.c.l.b16 %v131_v39 }
  0xbb   :  { %v156_v42 = vrot.slane %v155_v40, 7 }
  0xbd   :  { %v158_v43 = vsel %vm157_vm0, %v156_v42, %v154_v41 }
  0xbe   :  { %v159_v44 = vpack.c.b16 %v158_v43, %v158_v43 }
  0xc0   :  { %217 = vmatmul.bf16.vlgmr.msra.gmra.mxu1 %v159_v44 }
 0x13d   :  { %v218_v46 = vpop.f32.mrf.mxu1 }
 0x13e   :  { %v219_v47 = vadd.f32 %v327_v45, %v218_v46 }
 0x140   :  { %223 = vst.msk [vmem:[#allocation2] sm:$0x3] %vm222_vm1, %v219_v47 }
 0x141   :  { %234 = dma.vmem_to_hbm [thread:$0]  %s230_s12, 32, %s232_s14, [#allocation3]  }
 0x145   :  { %v220_v48 = vpop.f32.mrf.mxu1 }
 0x146   :  { %352 = dma.done.wait [#allocation3], 32  }
 0x147   :  { %353 = vsyncadd [#allocation3], 4294967264 }
 0x148   :  { %239 = vsyncpa [#allocation3], 1 }

</bundles_post_ra>
